<compile_context>
chip_gen: v7x
topology: tpu7x:2x2x1
jax: 0.10.0
libtpu: 0.0.40
codegen_flags: <defaults>
</compile_context>

<pallas_src>
import jax
import jax.numpy as jnp
from jax.experimental import pallas as pl
from jax.experimental.pallas import tpu as pltpu

_HIGH = jax.lax.Precision.HIGHEST


def _round_up(x, m):
    return ((x + m - 1) // m) * m


def _pick_tile(n, candidates, max_waste=0.10):
    """Largest candidate with <=max_waste padding; else minimal-padding one."""
    feasible = [c for c in candidates if (_round_up(n, c) - n) <= max_waste * n]
    if feasible:
        return max(feasible)
    return min(candidates, key=lambda c: (_round_up(n, c) - n, c))


def _pad2d(x, rows, cols, dtype):
    x = x.astype(dtype)
    if x.shape == (rows, cols):
        return x
    return jnp.zeros((rows, cols), dtype).at[: x.shape[0], : x.shape[1]].set(x)


# --------------------------------------------------------------------------- #
# Small-problem fast path: everything in one grid-less fused kernel.
# --------------------------------------------------------------------------- #
def _fused_small_kernel(adj_ref, feat_ref, wf_ref, bf_ref, out_ref):
    adj = adj_ref[...]
    deg = jnp.maximum(jnp.sum(adj, axis=1, keepdims=True), 1.0)   # guard isolated nodes
    norm = jax.lax.rsqrt(deg)                                     # deg ** -0.5 (EUP)
    y = jnp.dot(feat_ref[...] * norm, wf_ref[...],
                preferred_element_type=jnp.float32)
    h = jnp.dot(adj, y, preferred_element_type=jnp.float32)
    out_ref[...] = norm * h + bf_ref[...]


# --------------------------------------------------------------------------- #
# Tiled streaming aggregation:  out = norm * (adj @ y) + b_fused
# Accumulates directly into the f32 output block (resident over the k axis).
# --------------------------------------------------------------------------- #
def _make_agg_kernel(tk, y_resident):
    def _agg_kernel(adj_ref, y_ref, norm_ref, bf_ref, out_ref):
        k = pl.program_id(1)

        @pl.when(k == 0)
        def _init():
            out_ref[...] = jnp.zeros_like(out_ref)

        if y_resident:
            koff = pl.multiple_of(k * tk, tk)
            y_blk = y_ref[pl.ds(koff, tk), :]
        else:
            y_blk = y_ref[...]

        out_ref[...] += jnp.dot(adj_ref[...], y_blk,
                                preferred_element_type=jnp.float32)

        @pl.when(k == pl.num_programs(1) - 1)
        def _finalize():
            # Right-norm scale and fused bias applied exactly once.
            out_ref[...] = norm_ref[...] * out_ref[...] + bf_ref[...]

    return _agg_kernel


def base_tower(node_feat, adj, wc, bc, wp, bp, *, mxu_dtype=jnp.bfloat16):
    """BaseTower forward (inference).

    node_feat: (N, Din), adj: (N, N),
    wc: (Din, H) conv weight, bc: (H,) conv bias,
    wp: (H, H) proj weight (PyTorch out x in layout), bp: (H,) proj bias.
    mxu_dtype: operand dtype of the big adj@y matmul on the streaming path
               (bf16 halves adj HBM bytes; exact for 0/1 adjacency; f32 accum).
    Returns (N, H) float32.
    """
    node_feat = node_feat.astype(jnp.float32)
    adj = adj.astype(jnp.float32)
    N, Din = node_feat.shape
    H = wc.shape[1]

    # Fuse conv weight + projection (valid while dropout is identity).
    wp_t = wp.astype(jnp.float32).T                                    # (H, H)
    w_fused = jnp.dot(wc.astype(jnp.float32), wp_t, precision=_HIGH)   # (Din, H)
    b_fused = (jnp.dot(bc.reshape(1, H).astype(jnp.float32), wp_t, precision=_HIGH)
               + bp.reshape(1, H).astype(jnp.float32))                 # (1, H)

    # ---- small-problem fast path (module-default shapes live here) -------- #
    if N <= 512 and Din <= 256 and H <= 256:
        return pl.pallas_call(
            _fused_small_kernel,
            out_shape=jax.ShapeDtypeStruct((N, H), jnp.float32),
            compiler_params=pltpu.CompilerParams(
                vmem_limit_bytes=32 * 1024 * 1024),
        )(adj, node_feat, w_fused, b_fused)

    # ---- tiled streaming path --------------------------------------------- #
    # deg/norm + tiny pre-projection computed in XLA (fuses with the cast/pad
    # read of adj); the Pallas kernel never touches the f32 adj copy again.
    deg = jnp.maximum(jnp.sum(adj, axis=1, keepdims=True), 1.0)
    norm = jax.lax.rsqrt(deg)                                          # (N, 1)
    y = jnp.dot(node_feat * norm, w_fused, precision=_HIGH)            # (N, H)

    LANE = 128
    Hpad = _round_up(H, LANE)                       # lane-dense output stores
    TM = _pick_tile(N, (128, 256, 512))             # N > 512 here => grid[0] >= 2
    TK = _pick_tile(N, (256, 512, 1024, 2048))
    Mpad = _round_up(N, TM)
    Kpad = _round_up(N, TK)

    adj_p = _pad2d(adj, Mpad, Kpad, mxu_dtype)
    y_p = _pad2d(y, Kpad, Hpad, mxu_dtype)
    norm_p = _pad2d(norm, Mpad, 1, jnp.float32)
    bf_p = _pad2d(b_fused, 1, Hpad, jnp.float32)

    # Keep y fully VMEM-resident whenever it fits comfortably.
    y_resident = Kpad * Hpad * jnp.dtype(mxu_dtype).itemsize <= 12 * 1024 * 1024
    if y_resident:
        y_spec = pl.BlockSpec((Kpad, Hpad), lambda i, k: (0, 0))
    else:
        y_spec = pl.BlockSpec((TK, Hpad), lambda i, k: (k, 0))

    grid = (Mpad // TM, Kpad // TK)
    out_p = pl.pallas_call(
        _make_agg_kernel(TK, y_resident),
        out_shape=jax.ShapeDtypeStruct((Mpad, Hpad), jnp.float32),
        grid_spec=pltpu.PrefetchScalarGridSpec(
            num_scalar_prefetch=0,
            grid=grid,
            in_specs=[
                pl.BlockSpec((TM, TK), lambda i, k: (i, k)),    # adj tile (streamed once)
                y_spec,                                         # y (resident if it fits)
                pl.BlockSpec((TM, 1), lambda i, k: (i, 0)),     # norm (resident over k)
                pl.BlockSpec((1, Hpad), lambda i, k: (0, 0)),   # fused bias (resident)
            ],
            out_specs=pl.BlockSpec((TM, Hpad), lambda i, k: (i, 0)),  # f32 accumulator
        ),
        compiler_params=pltpu.CompilerParams(
            dimension_semantics=("parallel", "arbitrary"),
            vmem_limit_bytes=48 * 1024 * 1024,      # safe under v7x's 64 MiB VMEM
        ),
    )(adj_p, y_p, norm_p, bf_p)

    # TODO(synk): training-mode dropout (p=0.2) between conv and proj is omitted
    # (inference identity); the Wc@Wp^T fusion must be reverted if it is added.
    return out_p[:N, :H]


# --------------------------------------------------------------------------- #
# Reference + test harness
# --------------------------------------------------------------------------- #
def reference(node_feat, adj, wc, bc, wp, bp):
    deg = jnp.maximum(jnp.sum(adj, axis=1, keepdims=True), 1.0)
    norm = jax.lax.rsqrt(deg)
    h = jnp.dot(jnp.dot(adj, node_feat * norm, precision=_HIGH), wc, precision=_HIGH)
    h = h * norm + bc.reshape(1, -1)
    return jnp.dot(h, wp.T, precision=_HIGH) + bp.reshape(1, -1)


def _make_inputs(key, n, din, h, p_edge):
    k_feat, k_adj, k_wc, k_bc, k_wp, k_bp = jax.random.split(key, 6)
    node_feat = jax.random.normal(k_feat, (n, din), dtype=jnp.float32)
    a = (jax.random.uniform(k_adj, (n, n)) < p_edge).astype(jnp.float32)
    adj = jnp.clip(a + a.T + jnp.eye(n, dtype=jnp.float32), 0.0, 1.0)
    wc = jax.random.normal(k_wc, (din, h), dtype=jnp.float32) * 0.1
    bc = jax.random.normal(k_bc, (h,), dtype=jnp.float32) * 0.01
    wp = jax.random.normal(k_wp, (h, h), dtype=jnp.float32) * 0.1
    bp = jax.random.normal(k_bp, (h,), dtype=jnp.float32) * 0.01
    return node_feat, adj, wc, bc, wp, bp


if __name__ == "__main__":
    key = jax.random.PRNGKey(0)
    k_small, k_mid, k_big = jax.random.split(key, 3)

    # Module-implied shapes: N=8 nodes, in_feat_dim=32, h_feat_dim=32
    # -> single grid-less fused kernel, no padding, one launch.
    inputs = _make_inputs(k_small, 8, 32, 32, 0.4)
    ref = reference(*inputs)
    out = jax.block_until_ready(base_tower(*inputs))
    assert out.shape == (8, 32)
    assert jnp.allclose(out, ref, atol=5e-4, rtol=5e-4), "small-path mismatch"

    # Mid-size graph, still the fused single-kernel path.
    inputs_m = _make_inputs(k_mid, 300, 32, 32, 0.05)
    ref_m = reference(*inputs_m)
    out_m = jax.block_until_ready(base_tower(*inputs_m))
    assert out_m.shape == (300, 32)
    assert jnp.allclose(out_m, ref_m, atol=5e-4, rtol=5e-4), "mid-path mismatch"

    # Tiled streaming path (N > 512): exercises K-accumulation into out_ref,
    # VMEM-resident y, adaptive tiling, and the megacore-parallel M axis.
    inputs_b = _make_inputs(k_big, 700, 32, 32, 0.05)
    ref_b = reference(*inputs_b)
    out_b32 = jax.block_until_ready(base_tower(*inputs_b, mxu_dtype=jnp.float32))
    assert out_b32.shape == (700, 32)
    assert jnp.allclose(out_b32, ref_b, atol=5e-4, rtol=5e-4), "tiled f32 mismatch"

    # Default bf16 streaming operands (adj exact in bf16; y rounded -> looser tol).
    out_b16 = jax.block_until_ready(base_tower(*inputs_b))
    assert jnp.allclose(out_b16, ref_b, atol=2e-2, rtol=2e-2), "tiled bf16 mismatch"

    print("KERNEL_OK")
</pallas_src>

<mosaic_0001>
module attributes {stable_mosaic.version = 11 : i64} {
  func.func @_fused_small_kernel(%arg0: memref<8x8xf32, #tpu.memory_space<vmem>>, %arg1: memref<8x32xf32, #tpu.memory_space<vmem>>, %arg2: memref<32x32xf32, #tpu.memory_space<vmem>>, %arg3: memref<1x32xf32, #tpu.memory_space<vmem>>, %arg4: memref<8x32xf32, #tpu.memory_space<vmem>>) attributes {dimension_semantics = [], scalar_prefetch = 0 : i64, scratch_operands = 0 : i64, tpu.core_type = #tpu.core_type<tc>} {
    %c0 = arith.constant 0 : index
    %c0_0 = arith.constant 0 : index
    %0 = vector.load %arg0[%c0, %c0_0] : memref<8x8xf32, #tpu.memory_space<vmem>>, vector<8x8xf32>
    %cst = arith.constant dense<0.000000e+00> : vector<8xf32>
    %1 = vector.multi_reduction <add>, %0, %cst [1] : vector<8x8xf32> to vector<8xf32>
    %2 = vector.shape_cast %1 : vector<8xf32> to vector<8x1xf32>
    %cst_1 = arith.constant 1.000000e+00 : f32
    %3 = vector.broadcast %cst_1 : f32 to vector<8x1xf32>
    %4 = arith.maximumf %2, %3 : vector<8x1xf32>
    %5 = math.rsqrt %4 : vector<8x1xf32>
    %c0_2 = arith.constant 0 : index
    %c0_3 = arith.constant 0 : index
    %6 = vector.load %arg1[%c0_2, %c0_3] : memref<8x32xf32, #tpu.memory_space<vmem>>, vector<8x32xf32>
    %7 = vector.broadcast %5 : vector<8x1xf32> to vector<8x32xf32>
    %8 = arith.mulf %6, %7 : vector<8x32xf32>
    %c0_4 = arith.constant 0 : index
    %c0_5 = arith.constant 0 : index
    %9 = vector.load %arg2[%c0_4, %c0_5] : memref<32x32xf32, #tpu.memory_space<vmem>>, vector<32x32xf32>
    %cst_6 = arith.constant dense<0.000000e+00> : vector<8x32xf32>
    %10 = tpu.matmul %8, %9, %cst_6 {dimension_numbers = #tpu.dot_dimension_numbers<[1], [0], [0], [1], [0, 0, 1, 1], [], []>} : vector<8x32xf32>, vector<32x32xf32>, vector<8x32xf32> -> vector<8x32xf32>
    %cst_7 = arith.constant dense<0.000000e+00> : vector<8x32xf32>
    %11 = tpu.matmul %0, %10, %cst_7 {dimension_numbers = #tpu.dot_dimension_numbers<[1], [0], [0], [1], [0, 0, 1, 1], [], []>} : vector<8x8xf32>, vector<8x32xf32>, vector<8x32xf32> -> vector<8x32xf32>
    %12 = vector.broadcast %5 : vector<8x1xf32> to vector<8x32xf32>
    %13 = arith.mulf %12, %11 : vector<8x32xf32>
    %c0_8 = arith.constant 0 : index
    %c0_9 = arith.constant 0 : index
    %14 = vector.load %arg3[%c0_8, %c0_9] : memref<1x32xf32, #tpu.memory_space<vmem>>, vector<1x32xf32>
    %15 = vector.broadcast %14 : vector<1x32xf32> to vector<8x32xf32>
    %16 = arith.addf %13, %15 : vector<8x32xf32>
    %c0_10 = arith.constant 0 : index
    %c0_11 = arith.constant 0 : index
    %17 = vector.load %arg4[%c0_10, %c0_11] : memref<8x32xf32, #tpu.memory_space<vmem>>, vector<8x32xf32>
    tpu.vector_store %arg4[%c0_10, %c0_11], %16 {strides = array<i32>} : memref<8x32xf32, #tpu.memory_space<vmem>>, vector<8x32xf32>,
    return
  }
}

</mosaic_0001>

<bundles_post_ra>
// kernel: tpu_custom_call.1
= control target key start
LH: loop header
LB: loop body
LE: loop exit
PB: predicated region body
PF: predicated region fallthrough
CT: control target
= control target key end

     0   :  { %9 = vsyncpa [#allocation3], 0  ;;  %s465_s0 = inlined_call_operand.hbm [shape: f32[8,8], index: 0, kind: input, shape index: {}]   ;;  %s466_s1 = inlined_call_operand.hbm [shape: f32[8,32], index: 1, kind: input, shape index: {}]   ;;  %s467_s2 = inlined_call_operand.hbm [shape: f32[32,32], index: 2, kind: input, shape index: {}]   ;;  %s468_s3 = inlined_call_operand.vmem [shape: f32[1,32], index: 3, kind: input, shape index: {}]   ;;  %s469_s4 = inlined_call_operand.hbm [shape: f32[8,32], index: 4, kind: output, shape index: {}]  }
   0x1   :  { %10 = vsyncpa [#allocation6], 0 }
   0x2   :  { %11 = vsyncpa [#allocation4], 0  ;;  %s378_s15 = smov [#allocation5]   ;;  %s379_s17 = smov [#allocation2]  }
   0x3   :  { %s28_s16 = sshll.u32 %s378_s15, 4  ;;  %s18_s18 = sshll.u32 %s379_s17, 4  ;;  %s29_s16 = int_to_ptr.vmem [resolvable:$true] %s28_s16  ;;  %s19_s18 = int_to_ptr.vmem [resolvable:$true] %s18_s18 }
   0x4   :  { %s284_s21 = scalar_lea.hbm %s466_s1, 128 }
   0x5   :  { %p285_p0 = scmp.ne.s32.totalorder %s466_s1, %s284_s21  ;;  %p288_p1 = scmp.lt.u32.totalorder %s284_s21, %s466_s1 }
   0x7   :  { %p290_p2 = pnand %p288_p1, %p285_p0 }
   0x9   :  { %293 = shalt.err (!%p290_p2)
}
   0xa   :  { %s294_s26 = scalar_lea.vmem %s29_s16, 128  ;;  %p299_p4 = scmp.lt.s32.totalorder %s29_s16, %s29_s16 }
   0xb   :  { %p295_p3 = scmp.ne.s32.totalorder %s29_s16, %s294_s26  ;;  %p300_p5 = scmp.lt.s32.totalorder %s294_s26, %s294_s26 }
   0xd   :  { %p301_p6 = por %p300_p5, %p299_p4 }
   0xf   :  { %p302_p7 = pnand %p301_p6, %p295_p3 }
  0x11   :  { %305 = shalt.err (!%p302_p7)
}
  0x12   :  { %31 = dma.hbm_to_vmem [thread:$0]  %s466_s1, 128, %s29_s16, [#allocation6]  }
  0x13   :  { %s306_s5 = scalar_lea.hbm %s465_s0, 128 }
  0x14   :  { %p307_p8 = scmp.ne.s32.totalorder %s465_s0, %s306_s5  ;;  %p310_p9 = scmp.lt.u32.totalorder %s306_s5, %s465_s0 }
  0x16   :  { %p312_p10 = pnand %p310_p9, %p307_p8 }
  0x18   :  { %315 = shalt.err (!%p312_p10)
}
  0x19   :  { %s316_s10 = scalar_lea.vmem %s19_s18, 128  ;;  %p321_p12 = scmp.lt.s32.totalorder %s19_s18, %s19_s18 }
  0x1a   :  { %p317_p11 = scmp.ne.s32.totalorder %s19_s18, %s316_s10  ;;  %p322_p13 = scmp.lt.s32.totalorder %s316_s10, %s316_s10 }
  0x1c   :  { %p323_p0 = por %p322_p13, %p321_p12 }
  0x1e   :  { %p324_p1 = pnand %p323_p0, %p317_p11 }
  0x20   :  { %327 = shalt.err (!%p324_p1)
}
  0x21   :  { %21 = dma.hbm_to_vmem [thread:$0]  %s465_s0, 128, %s19_s18, [#allocation3]  }
  0x22   :  { %s380_s12 = smov [#allocation7]   ;;  %s328_s16 = scalar_lea.hbm %s467_s2, 512 }
  0x23   :  { %s37_s13 = sshll.u32 %s380_s12, 4  ;;  %p329_p2 = scmp.ne.s32.totalorder %s467_s2, %s328_s16  ;;  %s38_s13 = int_to_ptr.vmem [resolvable:$true] %s37_s13 }
  0x24   :  { %p332_p3 = scmp.lt.u32.totalorder %s328_s16, %s467_s2 }
  0x26   :  { %p334_p4 = pnand %p332_p3, %p329_p2 }
  0x28   :  { %337 = shalt.err (!%p334_p4)
}
  0x29   :  { %s338_s22 = scalar_lea.vmem %s38_s13, 512  ;;  %p343_p6 = scmp.lt.s32.totalorder %s38_s13, %s38_s13 }
  0x2a   :  { %p339_p5 = scmp.ne.s32.totalorder %s38_s13, %s338_s22  ;;  %p344_p7 = scmp.lt.s32.totalorder %s338_s22, %s338_s22 }
  0x2c   :  { %p345_p8 = por %p344_p7, %p343_p6 }
  0x2e   :  { %p346_p9 = pnand %p345_p8, %p339_p5 }
  0x30   :  { %349 = shalt.err (!%p346_p9)
}
  0x31   :  { %s381_s0 = smov 128   ;;  %s382_s18 = smov 8  }
  0x32   :  { %43 = dma.hbm_to_vmem [thread:$0]  %s467_s2, 512, %s38_s13, [#allocation6], %s381_s0, %s381_s0, %s382_s18  }
  0x33   :  { %372 = dma.done.wait [#allocation3], 128  }
  0x34   :  { %373 = vsyncadd [#allocation3], 4294967168 }
  0x35   :  { %374 = dma.done.wait [#allocation6], 640  }
  0x36   :  { %375 = vsyncadd [#allocation6], 4294966656  ;;  %vm56_vm0 = vcmask 64512   ;;  %v55_v0 = vld [vmem:[#allocation2] sm:$0xff]  ;;  %v64_v2 = vld [vmem:[#allocation7] sm:$0xff]  ;;  %v383_v5 = vmov 0.0|0.0  }
  0x37   :  { %v57_v1 = vsel %vm56_vm0, %v55_v0, 0.0  ;;  %v65_v3 = vld [vmem:[#allocation7 + $0x8] sm:$0xff]  ;;  %v66_v4 = vld [vmem:[#allocation7 + $0x10] sm:$0xff]  ;;  %267 = vmatprep.subr.bf16.mxu0 %v383_v5  ;;  %v67_v7 = vld [vmem:[#allocation7 + $0x18] sm:$0xff]  ;;  %vm384_vm1 = vmmov 0   ;;  %v385_v8 = vmov 0.0  }
  0x38   :  { %58 = vadd.xlane.f32.xlu0 %v57_v1  ;;  %v268_v6 = vpack.c.bf16 %v65_v3, %v64_v2  ;;  %259 = vmatprep.mubr.msk.f32.mxu0 %vm384_vm1, %v385_v8  ;;  %v271_v9 = vpack.c.bf16 %v67_v7, %v66_v4  ;;  %v62_v12 = vld [vmem:[#allocation5] sm:$0xff]  ;;  %vm68_vm2 = vcmask 261120   ;;  %v243_v18 = vld [vmem:[%s468_s3] ss:$0 sm:$0xff]  ;;  %s386_s26 = smov [#allocation8]  }
  0x39   :  { %262 = vmatprep.subr.mxu1 %v385_v8  ;;  %264 = vmatprep.mubr.msk.f32.mxu1 %vm384_vm1, %v385_v8  ;;  %s231_s27 = sshll.u32 %s386_s26, 4  ;;  %s232_s27 = int_to_ptr.vmem [resolvable:$true] %s231_s27 }
  0x3a   :  { %269 = vmatpush3.bf16.msra.mxu0 %v268_v6  ;;  %s350_s28 = scalar_lea.vmem %s232_s27, 128  ;;  %p355_p11 = scmp.lt.s32.totalorder %s232_s27, %s232_s27 }
  0x3b   :  { %270 = vmatprep.subr.bf16.mxu0 %v383_v5  ;;  %p351_p10 = scmp.ne.s32.totalorder %s232_s27, %s350_s28  ;;  %p356_p12 = scmp.lt.s32.totalorder %s350_s28, %s350_s28 }
  0x3d   :  { %p357_p13 = por %p356_p12, %p355_p11 }
  0x3e   :  { %272 = vmatpush3.bf16.msra.mxu0 %v271_v9 }
  0x3f   :  { %p358_p0 = pnand %p357_p13, %p351_p10 }
  0xc5   :  { %v59_v10 = vpop.xlane.xlu0 %58 }
  0xc6   :  { %v60_v11 = vmax.f32 %v59_v10, 1.0 }
  0xc8   :  { %282 = vrsqrt.f32 %v60_v11 }
  0xd2   :  { %v283_v13 = vpop.eup %282 }
  0xd3   :  { %v63_v14 = vmul.f32 %v283_v13, %v62_v12 }
  0xd5   :  { %260 = vmatmul.mubr.msk.f32.vlgmr.msra.gmra.mrb[0].mxu0 %vm68_vm2, %v63_v14 }
 0x1a8   :  { %v138_v15 = vpop.f32.mrb[0].mxu0 }
 0x1a9   :  { %v261_v16 = vpop.f32.mrb[1].mxu0  ;;  %263 = vmatpush3.msra.mxu1 %v138_v15 }
 0x1aa   :  { %265 = vmatmul.mubr.msk.f32.vlgmr.msra.gmra.mrb[0].mxu1 %vm56_vm0, %v55_v0 }
 0x27d   :  { %v211_v17 = vpop.f32.mrb[0].mxu1 }
 0x27e   :  { %v215_v19 = vmul.f32 %v283_v13, %v211_v17  ;;  %v266_v20 = vpop.f32.mrb[1].mxu1 }
 0x280   :  { %v223_v21 = vadd.f32 %v243_v18, %v215_v19 }
 0x282   :  { %224 = vst.msk [vmem:[#allocation8] sm:$0xff] %vm68_vm2, %v223_v21 }
 0x283   :  { %361 = shalt.err (!%p358_p0)
}
 0x284   :  { %s362_s5 = scalar_lea.hbm %s469_s4, 128 }
 0x285   :  { %p363_p1 = scmp.ne.s32.totalorder %s469_s4, %s362_s5  ;;  %p366_p2 = scmp.lt.u32.totalorder %s362_s5, %s469_s4 }
 0x287   :  { %p368_p3 = pnand %p366_p2, %p363_p1 }
 0x289   :  { %371 = shalt.err (!%p368_p3)
}
 0x28a   :  { %234 = dma.vmem_to_hbm [thread:$0]  %s232_s27, 128, %s469_s4, [#allocation4]  }
 0x28b   :  { %376 = dma.done.wait [#allocation4], 128  }
 0x28c   :  { %377 = vsyncadd [#allocation4], 4294967168 }
 0x28d   :  { %238 = vsyncpa [#allocation3], 1 }
 0x28e   :  { %239 = vsyncpa [#allocation6], 1 }
 0x28f   :  { %240 = vsyncpa [#allocation4], 1 }

</bundles_post_ra>
